<compile_context>
chip_gen: v7x
topology: tpu7x:2x2x1
jax: 0.10.0
libtpu: 0.0.40
codegen_flags: <defaults>
</compile_context>

<pallas_src>
import functools

import jax
import jax.numpy as jnp
from jax import lax
from jax.experimental import pallas as pl
from jax.experimental.pallas import tpu as pltpu

EPS = 1e-5

# 8192 rows x 128 lanes x 4 B = 4 MiB input tile, 8 MiB 2-channel output tile;
# ~24 MiB double-buffered for pass 2.  The explicit vmem_limit_bytes makes this
# safe on v5e's 16 MiB scoped default and leaves headroom under v7x's 64 MiB
# physical VMEM.
_MAX_TILE_ROWS = 8192
_VMEM_LIMIT_BYTES = 48 * 1024 * 1024


def _row_tiling(rows):
    """(r_tile, num_row_tiles, need_row_mask) for a (rows, 128) per-sample view."""
    if rows <= _MAX_TILE_ROWS:
        return rows, 1, False            # single full-dim tile (exempt from %8 rule)
    r_tile = _MAX_TILE_ROWS              # multiple of 8 -> valid sublane block size
    num_rt = pl.cdiv(rows, r_tile)
    return r_tile, num_rt, (rows % r_tile) != 0


def _stats_kernel(x_ref, sum_ref, sq_ref, *, r_tile, rows, need_mask):
    """Per-sample lane-wise sum / sum-of-squares, accumulated across row tiles."""
    r = pl.program_id(1)

    @pl.when(r == 0)
    def _():
        sum_ref[...] = jnp.zeros_like(sum_ref)
        sq_ref[...] = jnp.zeros_like(sq_ref)

    x = x_ref[0]                                              # (r_tile, 128) f32
    if need_mask:
        # Last row tile is partial: zero out rows past the valid extent so the
        # OOB-padded garbage does not perturb the statistics.
        row_ids = r * r_tile + lax.broadcasted_iota(jnp.int32, x.shape, 0)
        x = jnp.where(row_ids < rows, x, 0.0)

    if r_tile % 8 == 0:
        # Pure elementwise (VPU) accumulation into a full (8, 128) vreg slab.
        xr = x.reshape(r_tile // 8, 8, 128)
        sum_ref[0] += xr.sum(axis=0)
        sq_ref[0] += (xr * xr).sum(axis=0)
    else:
        # Tiny single-tile case (r_tile == rows < 8k and not a multiple of 8).
        sum_ref[0] += jnp.sum(x, axis=0, keepdims=True)       # (1, 128)
        sq_ref[0] += jnp.sum(x * x, axis=0, keepdims=True)    # (1, 128)


def _affine_kernel(scale_ref, shift_ref, x_ref, o_ref, *, n_out):
    """Fused conv(1x1x1) + BN: one FMA per element per output channel."""
    x = x_ref[0]                          # (r_tile, 128)
    for c in range(n_out):                # Cout == 2, static unroll
        o_ref[0, c] = x * scale_ref[c] + shift_ref[c]


@jax.jit
def dummy_model_forward(x, w, b, gamma, beta):
    """x: (N, 1, D, H, W) f32 -> (N, Cout, D, H, W) f32 (training-mode BN)."""
    N, Cin, D, H, W = x.shape
    assert Cin == 1, "fold below relies on Conv3d(in_channels=1, ..., kernel=1)"
    Cout = gamma.shape[0]
    w1 = w.reshape(-1).astype(jnp.float32)        # (Cout,) conv weights (Cin == 1)

    dhw = D * H * W
    rows = pl.cdiv(dhw, 128)
    pad = rows * 128 - dhw
    r_tile, num_rt, need_mask = _row_tiling(rows)
    sb = 8 if r_tile % 8 == 0 else 1              # sublanes of the stats partials

    xf = x.reshape(N, dhw)
    if pad:
        # TODO(synk): ragged D*H*W (not a multiple of 128) falls back to one
        # padded copy of x plus a final output slice (extra HBM traffic).  The
        # lane-aligned path (pad == 0, as in the test below) emits no pad/slice.
        xf = jnp.pad(xf, ((0, 0), (0, pad)))      # zeros don't perturb the stats
    x3 = xf.reshape(N, rows, 128)                 # lane-dense view of the input

    bytes_x = N * rows * 128 * 4

    # ---- pass 1: per-sample partial sums of x and x^2 ---------------------------
    stats_cost = pl.CostEstimate(flops=3 * N * rows * 128, transcendentals=0,
                                 bytes_accessed=bytes_x + 2 * N * sb * 128 * 4)
    sum_p, sq_p = pl.pallas_call(
        functools.partial(_stats_kernel, r_tile=r_tile, rows=rows,
                          need_mask=need_mask),
        out_shape=(jax.ShapeDtypeStruct((N, sb, 128), jnp.float32),
                   jax.ShapeDtypeStruct((N, sb, 128), jnp.float32)),
        grid=(N, num_rt),
        in_specs=[pl.BlockSpec((1, r_tile, 128), lambda n, r: (n, r, 0))],
        out_specs=(pl.BlockSpec((1, sb, 128), lambda n, r: (n, 0, 0)),
                   pl.BlockSpec((1, sb, 128), lambda n, r: (n, 0, 0))),
        compiler_params=pltpu.CompilerParams(
            dimension_semantics=("parallel", "arbitrary"),
            vmem_limit_bytes=_VMEM_LIMIT_BYTES),
        cost_estimate=stats_cost,
    )(x3)

    # ---- fold conv weight / gamma / beta / batch stats into per-channel scalars
    count = jnp.float32(N * dhw)                  # true element count (no pad)
    mean_x = jnp.sum(sum_p) / count
    # Single-pass E[x^2] - E[x]^2 in f32 (partials accumulated in f32 slabs);
    # clamp guards tiny negative values from cancellation.
    var_x = jnp.maximum(jnp.sum(sq_p) / count - mean_x * mean_x, 0.0)
    scale = (gamma.astype(jnp.float32) * w1
             * lax.rsqrt(w1 * w1 * var_x + EPS))              # (Cout,)
    shift = beta.astype(jnp.float32) - scale * mean_x         # (Cout,)
    # Conv bias `b` cancels under training-mode BN (mean subtraction); unused here.
    del b

    # ---- pass 2: streaming per-channel FMA, output written directly in NCDHW ---
    affine_cost = pl.CostEstimate(flops=2 * Cout * N * rows * 128,
                                  transcendentals=0,
                                  bytes_accessed=bytes_x * (1 + Cout))
    out4 = pl.pallas_call(
        functools.partial(_affine_kernel, n_out=Cout),
        out_shape=jax.ShapeDtypeStruct((N, Cout, rows, 128), jnp.float32),
        grid=(N, num_rt),
        in_specs=[pl.BlockSpec(memory_space=pltpu.MemorySpace.SMEM),   # scale
                  pl.BlockSpec(memory_space=pltpu.MemorySpace.SMEM),   # shift
                  pl.BlockSpec((1, r_tile, 128), lambda n, r: (n, r, 0))],
        out_specs=pl.BlockSpec((1, Cout, r_tile, 128), lambda n, r: (n, 0, r, 0)),
        compiler_params=pltpu.CompilerParams(
            dimension_semantics=("parallel", "parallel"),
            vmem_limit_bytes=_VMEM_LIMIT_BYTES),
        cost_estimate=affine_cost,
    )(scale, shift, x3)

    out = out4.reshape(N, Cout, rows * 128)
    if pad:
        out = out[:, :, :dhw]
    return out.reshape(N, Cout, D, H, W)          # NCDHW-contiguous: no transpose


def _reference(x, w2, b, gamma, beta):
    """Plain-JAX reference: Conv3d(1x1x1) + training-mode (Sync)BatchNorm."""
    y = jnp.einsum("ncdhw,oc->nodhw", x, w2) + b.reshape(1, -1, 1, 1, 1)
    mean = jnp.mean(y, axis=(0, 2, 3, 4), keepdims=True)
    var = jnp.mean((y - mean) ** 2, axis=(0, 2, 3, 4), keepdims=True)
    return (gamma.reshape(1, -1, 1, 1, 1) * (y - mean) * lax.rsqrt(var + EPS)
            + beta.reshape(1, -1, 1, 1, 1))


if __name__ == "__main__":
    key = jax.random.PRNGKey(0)
    kx, kw, kb, kg, kbeta = jax.random.split(key, 5)

    # Small NCDHW input consistent with Conv3d(1, 2, 1): (N=2, Cin=1, D=4, H=8, W=8)
    N, Cin, Cout, D, H, W = 2, 1, 2, 4, 8, 8
    x = jax.random.normal(kx, (N, Cin, D, H, W), dtype=jnp.float32)

    # Parameters (shapes from the module's __init__); perturb BN affine so the
    # gamma/beta fold is actually exercised.
    w = jax.random.normal(kw, (Cout, Cin, 1, 1, 1), dtype=jnp.float32) * 0.5
    b = jax.random.normal(kb, (Cout,), dtype=jnp.float32) * 0.1
    gamma = 1.0 + 0.1 * jax.random.normal(kg, (Cout,), dtype=jnp.float32)
    beta = 0.1 * jax.random.normal(kbeta, (Cout,), dtype=jnp.float32)

    out = dummy_model_forward(x, w, b, gamma, beta)
    out = jax.block_until_ready(out)

    ref = _reference(x, w.reshape(Cout, Cin), b, gamma, beta)
    assert out.shape == (N, Cout, D, H, W)
    assert jnp.allclose(out, ref, atol=1e-4, rtol=1e-4), \
        float(jnp.max(jnp.abs(out - ref)))

    print("KERNEL_OK")
</pallas_src>

<mosaic_0001>
module attributes {stable_mosaic.version = 11 : i64} {
  func.func @_stats_kernel(%arg0: i32, %arg1: i32, %arg2: memref<1x2x128xf32, #tpu.memory_space<vmem>>, %arg3: memref<1x1x128xf32, #tpu.memory_space<vmem>>, %arg4: memref<1x1x128xf32, #tpu.memory_space<vmem>>) attributes {dimension_semantics = [#tpu.dimension_semantics<parallel>, #tpu.dimension_semantics<arbitrary>], iteration_bounds = array<i64: 2, 1>, scalar_prefetch = 0 : i64, scratch_operands = 0 : i64, tpu.core_type = #tpu.core_type<tc>, window_params = [{transform_indices = @transform_0, window_bounds = array<i64: 1, 2, 128>}, {transform_indices = @transform_1, window_bounds = array<i64: 1, 1, 128>}, {transform_indices = @transform_2, window_bounds = array<i64: 1, 1, 128>}]} {
    %c0_i32 = arith.constant 0 : i32
    %0 = arith.cmpi eq, %arg1, %c0_i32 : i32
    %1 = arith.extui %0 : i1 to i32
    %c0_i32_0 = arith.constant 0 : i32
    %2 = arith.cmpi ne, %1, %c0_i32_0 : i32
    scf.if %2 {
      %cst_16 = arith.constant 0.000000e+00 : f32
      %22 = vector.broadcast %cst_16 : f32 to vector<1x1x128xf32>
      %c0_17 = arith.constant 0 : index
      %c0_18 = arith.constant 0 : index
      %c0_19 = arith.constant 0 : index
      %23 = vector.load %arg3[%c0_17, %c0_18, %c0_19] : memref<1x1x128xf32, #tpu.memory_space<vmem>>, vector<1x1x128xf32>
      tpu.vector_store %arg3[%c0_17, %c0_18, %c0_19], %22 {strides = array<i32>} : memref<1x1x128xf32, #tpu.memory_space<vmem>>, vector<1x1x128xf32>,
      %cst_20 = arith.constant 0.000000e+00 : f32
      %24 = vector.broadcast %cst_20 : f32 to vector<1x1x128xf32>
      %c0_21 = arith.constant 0 : index
      %c0_22 = arith.constant 0 : index
      %c0_23 = arith.constant 0 : index
      %25 = vector.load %arg4[%c0_21, %c0_22, %c0_23] : memref<1x1x128xf32, #tpu.memory_space<vmem>>, vector<1x1x128xf32>
      tpu.vector_store %arg4[%c0_21, %c0_22, %c0_23], %24 {strides = array<i32>} : memref<1x1x128xf32, #tpu.memory_space<vmem>>, vector<1x1x128xf32>,
    } else {
    }
    %c0 = arith.constant 0 : index
    %c0_1 = arith.constant 0 : index
    %c0_2 = arith.constant 0 : index
    %3 = vector.load %arg2[%c0, %c0_1, %c0_2] : memref<1x2x128xf32, #tpu.memory_space<vmem>>, vector<1x2x128xf32>
    %4 = vector.shape_cast %3 : vector<1x2x128xf32> to vector<2x128xf32>
    %c0_3 = arith.constant 0 : index
    %c0_4 = arith.constant 0 : index
    %c0_5 = arith.constant 0 : index
    %5 = vector.load %arg3[%c0_3, %c0_4, %c0_5] : memref<1x1x128xf32, #tpu.memory_space<vmem>>, vector<1x1x128xf32>
    %6 = vector.shape_cast %5 : vector<1x1x128xf32> to vector<1x128xf32>
    %cst = arith.constant dense<0.000000e+00> : vector<128xf32>
    %7 = vector.multi_reduction <add>, %4, %cst [0] : vector<2x128xf32> to vector<128xf32>
    %8 = vector.shape_cast %7 : vector<128xf32> to vector<1x128xf32>
    %9 = arith.addf %6, %8 : vector<1x128xf32>
    %c0_6 = arith.constant 0 : index
    %c0_7 = arith.constant 0 : index
    %c0_8 = arith.constant 0 : index
    %10 = vector.load %arg3[%c0_6, %c0_7, %c0_8] : memref<1x1x128xf32, #tpu.memory_space<vmem>>, vector<1x1x128xf32>
    %11 = vector.shape_cast %10 : vector<1x1x128xf32> to vector<1x128xf32>
    %12 = vector.shape_cast %9 : vector<1x128xf32> to vector<1x1x128xf32>
    tpu.vector_store %arg3[%c0_6, %c0_7, %c0_8], %12 {strides = array<i32>} : memref<1x1x128xf32, #tpu.memory_space<vmem>>, vector<1x1x128xf32>,
    %c0_9 = arith.constant 0 : index
    %c0_10 = arith.constant 0 : index
    %c0_11 = arith.constant 0 : index
    %13 = vector.load %arg4[%c0_9, %c0_10, %c0_11] : memref<1x1x128xf32, #tpu.memory_space<vmem>>, vector<1x1x128xf32>
    %14 = vector.shape_cast %13 : vector<1x1x128xf32> to vector<1x128xf32>
    %15 = arith.mulf %4, %4 : vector<2x128xf32>
    %cst_12 = arith.constant dense<0.000000e+00> : vector<128xf32>
    %16 = vector.multi_reduction <add>, %15, %cst_12 [0] : vector<2x128xf32> to vector<128xf32>
    %17 = vector.shape_cast %16 : vector<128xf32> to vector<1x128xf32>
    %18 = arith.addf %14, %17 : vector<1x128xf32>
    %c0_13 = arith.constant 0 : index
    %c0_14 = arith.constant 0 : index
    %c0_15 = arith.constant 0 : index
    %19 = vector.load %arg4[%c0_13, %c0_14, %c0_15] : memref<1x1x128xf32, #tpu.memory_space<vmem>>, vector<1x1x128xf32>
    %20 = vector.shape_cast %19 : vector<1x1x128xf32> to vector<1x128xf32>
    %21 = vector.shape_cast %18 : vector<1x128xf32> to vector<1x1x128xf32>
    tpu.vector_store %arg4[%c0_13, %c0_14, %c0_15], %21 {strides = array<i32>} : memref<1x1x128xf32, #tpu.memory_space<vmem>>, vector<1x1x128xf32>,
    return
  }
  func.func @transform_0(%arg0: i32, %arg1: i32) -> (i32, i32, i32) {
    %c0_i32 = arith.constant 0 : i32
    %c0_i32_0 = arith.constant 0 : i32
    return %arg0, %arg1, %c0_i32 : i32, i32, i32
  }
  func.func @transform_1(%arg0: i32, %arg1: i32) -> (i32, i32, i32) {
    %c0_i32 = arith.constant 0 : i32
    %c0_i32_0 = arith.constant 0 : i32
    %c0_i32_1 = arith.constant 0 : i32
    return %arg0, %c0_i32, %c0_i32_0 : i32, i32, i32
  }
  func.func @transform_2(%arg0: i32, %arg1: i32) -> (i32, i32, i32) {
    %c0_i32 = arith.constant 0 : i32
    %c0_i32_0 = arith.constant 0 : i32
    %c0_i32_1 = arith.constant 0 : i32
    return %arg0, %c0_i32, %c0_i32_0 : i32, i32, i32
  }
}

module attributes {stable_mosaic.version = 11 : i64} {
  func.func @_affine_kernel(%arg0: i32, %arg1: i32, %arg2: memref<2xf32, #tpu.memory_space<smem>>, %arg3: memref<2xf32, #tpu.memory_space<smem>>, %arg4: memref<1x2x128xf32, #tpu.memory_space<vmem>>, %arg5: memref<1x2x2x128xf32, #tpu.memory_space<vmem>>) attributes {dimension_semantics = [#tpu.dimension_semantics<parallel>, #tpu.dimension_semantics<parallel>], iteration_bounds = array<i64: 2, 1>, scalar_prefetch = 0 : i64, scratch_operands = 0 : i64, tpu.core_type = #tpu.core_type<tc>, window_params = [{transform_indices = @transform_0, window_bounds = array<i64: 2>}, {transform_indices = @transform_1, window_bounds = array<i64: 2>}, {transform_indices = @transform_2, window_bounds = array<i64: 1, 2, 128>}, {transform_indices = @transform_3, window_bounds = array<i64: 1, 2, 2, 128>}]} {
    %c0 = arith.constant 0 : index
    %c0_0 = arith.constant 0 : index
    %c0_1 = arith.constant 0 : index
    %0 = vector.load %arg4[%c0, %c0_0, %c0_1] : memref<1x2x128xf32, #tpu.memory_space<vmem>>, vector<1x2x128xf32>
    %1 = vector.shape_cast %0 : vector<1x2x128xf32> to vector<2x128xf32>
    %c0_2 = arith.constant 0 : index
    %2 = memref.load %arg2[%c0_2] : memref<2xf32, #tpu.memory_space<smem>>
    %3 = vector.broadcast %2 : f32 to vector<2x128xf32>
    %4 = arith.mulf %1, %3 : vector<2x128xf32>
    %c0_3 = arith.constant 0 : index
    %5 = memref.load %arg3[%c0_3] : memref<2xf32, #tpu.memory_space<smem>>
    %6 = vector.broadcast %5 : f32 to vector<2x128xf32>
    %7 = arith.addf %4, %6 : vector<2x128xf32>
    %c0_4 = arith.constant 0 : index
    %c0_5 = arith.constant 0 : index
    %c0_6 = arith.constant 0 : index
    %c0_7 = arith.constant 0 : index
    %8 = vector.load %arg5[%c0_4, %c0_5, %c0_6, %c0_7] : memref<1x2x2x128xf32, #tpu.memory_space<vmem>>, vector<1x1x2x128xf32>
    %9 = vector.shape_cast %8 : vector<1x1x2x128xf32> to vector<2x128xf32>
    %10 = vector.shape_cast %7 : vector<2x128xf32> to vector<1x1x2x128xf32>
    tpu.vector_store %arg5[%c0_4, %c0_5, %c0_6, %c0_7], %10 {strides = array<i32>} : memref<1x2x2x128xf32, #tpu.memory_space<vmem>>, vector<1x1x2x128xf32>,
    %c1 = arith.constant 1 : index
    %11 = memref.load %arg2[%c1] : memref<2xf32, #tpu.memory_space<smem>>
    %12 = vector.broadcast %11 : f32 to vector<2x128xf32>
    %13 = arith.mulf %1, %12 : vector<2x128xf32>
    %c1_8 = arith.constant 1 : index
    %14 = memref.load %arg3[%c1_8] : memref<2xf32, #tpu.memory_space<smem>>
    %15 = vector.broadcast %14 : f32 to vector<2x128xf32>
    %16 = arith.addf %13, %15 : vector<2x128xf32>
    %c0_9 = arith.constant 0 : index
    %c1_10 = arith.constant 1 : index
    %c0_11 = arith.constant 0 : index
    %c0_12 = arith.constant 0 : index
    %17 = vector.load %arg5[%c0_9, %c1_10, %c0_11, %c0_12] : memref<1x2x2x128xf32, #tpu.memory_space<vmem>>, vector<1x1x2x128xf32>
    %18 = vector.shape_cast %17 : vector<1x1x2x128xf32> to vector<2x128xf32>
    %19 = vector.shape_cast %16 : vector<2x128xf32> to vector<1x1x2x128xf32>
    tpu.vector_store %arg5[%c0_9, %c1_10, %c0_11, %c0_12], %19 {strides = array<i32>} : memref<1x2x2x128xf32, #tpu.memory_space<vmem>>, vector<1x1x2x128xf32>,
    return
  }
  func.func @transform_0(%arg0: i32, %arg1: i32) -> i32 {
    %c0_i32 = arith.constant 0 : i32
    %c0_i32_0 = arith.constant 0 : i32
    return %c0_i32 : i32
  }
  func.func @transform_1(%arg0: i32, %arg1: i32) -> i32 {
    %c0_i32 = arith.constant 0 : i32
    %c0_i32_0 = arith.constant 0 : i32
    return %c0_i32 : i32
  }
  func.func @transform_2(%arg0: i32, %arg1: i32) -> (i32, i32, i32) {
    %c0_i32 = arith.constant 0 : i32
    %c0_i32_0 = arith.constant 0 : i32
    return %arg0, %arg1, %c0_i32 : i32, i32, i32
  }
  func.func @transform_3(%arg0: i32, %arg1: i32) -> (i32, i32, i32, i32) {
    %c0_i32 = arith.constant 0 : i32
    %c0_i32_0 = arith.constant 0 : i32
    %c0_i32_1 = arith.constant 0 : i32
    return %arg0, %c0_i32, %arg1, %c0_i32_0 : i32, i32, i32, i32
  }
}

</mosaic_0001>

<bundles_post_ra>
// kernel: dummy_model_forward.2
= control target key start
LH: loop header
LB: loop body
LE: loop exit
PB: predicated region body
PF: predicated region fallthrough
CT: control target
= control target key end

     0   :  { %s354_s9 = smov 0   ;;  %s356_s10 = smov 0   ;;  %s390_s0 = inlined_call_operand.vmem [shape: f32[2,2,128], index: 0, kind: input, shape index: {}]   ;;  %s391_s1 = inlined_call_operand.vmem [shape: f32[2,1,128], index: 1, kind: output, shape index: {0}]   ;;  %s392_s2 = inlined_call_operand.vmem [shape: f32[2,1,128], index: 2, kind: output, shape index: {1}]  }
   0x1   :  { %s358_s11 = smov 0  }
   0x2 LB: > { %s25_s12 = sadd.s32 1, %s332_s10  ;;  %p285_p0 = scmp.ge.s32.totalorder %s336_s11, 1  ;;  %s336_s11 = sphi %s358_s11, %s13_s11   ;;  %s332_s10 = sphi %s356_s10, %s394_s10   ;;  %s328_s9 = sphi %s354_s9, %s393_s9  }
   0x3   : > { %p27_p1 = scmp.ge.s32.totalorder %s25_s12, 2  ;;  %p131_p2 = scmp.lt.s32.totalorder %s336_s11, 3 }
   0x5   : > { %s396_s12 = smov (%p27_p1, %s25_s12), 0  ;;  %p132_p3 = pnand %p285_p0, %p131_p2 }
   0x6   : > { %p156_p4 = scmp.lt.s32.totalorder (!%p132_p3), %s328_s9, 1  ;;  %vm177_vm0 = vcmask (!%p132_p3), 1041408   ;;  %v338_v0 = vmov (!%p132_p3), 0.0  }
   0x7   : > { %135 = sbr.rel (%p132_p3) target bundleno = 36 (0x24), region = 24 }
   0xe   : > { %s398_s9 = smov (!%p156_p4, %s328_s9), 1 }
   0xf   : > { %s286_s13 = sshll.u32 %s398_s9, 1  ;;  %s165_s16 = scalar_lea.vmem %s391_s1, %s398_s9 }
  0x10   : > { %s162_s19 = scalar_lea.vmem %s390_s0, %s286_s13  ;;  %173 = vst [vmem:[%s165_s16] sm:$0x1] %v338_v0  ;;  %s168_s22 = scalar_lea.vmem %s392_s2, %s398_s9 }
  0x11   : > { %v175_v1 = vld [vmem:[%s162_s19] sm:$0x3]  ;;  %174 = vst [vmem:[%s168_s22] sm:$0x1] %v338_v0 }
  0x12   : > { %v188_v2 = vmul.f32 %v175_v1, %v175_v1  ;;  %v178_v3 = vsel %vm177_vm0, %v175_v1, 0.0 }
  0x13   : > { %v179_v4 = vrot.slane %v178_v3, 4 }
  0x14   : > { %v189_v5 = vsel %vm177_vm0, %v188_v2, 0.0 }
  0x15   : > { %v180_v6 = vadd.f32 %v179_v4, %v178_v3  ;;  %v190_v7 = vrot.slane %v189_v5, 4 }
  0x17   : > { %v181_v8 = vrot.slane %v180_v6, 2  ;;  %v191_v9 = vadd.f32 %v190_v7, %v189_v5  ;;  %v176_v14 = vld [vmem:[%s165_s16] sm:$0x1] }
  0x18   : > { %v187_v17 = vld [vmem:[%s168_s22] sm:$0x1] }
  0x19   : > { %v182_v10 = vadd.f32 %v181_v8, %v180_v6  ;;  %v192_v11 = vrot.slane %v191_v9, 2 }
  0x1b   : > { %v183_v12 = vrot.slane %v182_v10, 1  ;;  %v193_v13 = vadd.f32 %v192_v11, %v191_v9 }
  0x1d   : > { %v184_v15 = vadd.f32 %v183_v12, %v182_v10  ;;  %v194_v16 = vrot.slane %v193_v13, 1 }
  0x1f   : > { %v185_v18 = vadd.f32 %v184_v15, %v176_v14  ;;  %v195_v19 = vadd.f32 %v194_v16, %v193_v13 }
  0x21   : > { %186 = vst [vmem:[%s165_s16] sm:$0x1] %v185_v18  ;;  %v196_v20 = vadd.f32 %v195_v19, %v187_v17 }
  0x23   : > { %197 = vst [vmem:[%s168_s22] sm:$0x1] %v196_v20 }
  0x24 PF: > { %s13_s11 = sadd.s32 1, %s336_s11   ;;  %s393_s9 = smov %s332_s10 }
  0x25   : > { %p10_p5 = scmp.ge.s32.totalorder %s13_s11, 4   ;;  %s394_s10 = smov %s396_s12 }
  0x27   :  { %12 = sbr.rel (!%p10_p5) target bundleno = 2 (0x2), region = 70 }

// kernel: dummy_model_forward.3
= control target key start
LH: loop header
LB: loop body
LE: loop exit
PB: predicated region body
PF: predicated region fallthrough
CT: control target
= control target key end

     0   :  { %8 = vsyncpa [#allocation3], 0  ;;  %s568_s0 = inlined_call_operand.vmem [shape: f32[2], index: 0, kind: input, shape index: {}]   ;;  %s569_s1 = inlined_call_operand.vmem [shape: f32[2], index: 1, kind: input, shape index: {}]   ;;  %s570_s2 = inlined_call_operand.vmem [shape: f32[2,2,128], index: 2, kind: input, shape index: {}]   ;;  %s571_s3 = inlined_call_operand.vmem [shape: f32[2,2,2,128], index: 3, kind: output, shape index: {}]  }
   0x1   :  { %9 = vsyncpa [#allocation5], 0  ;;  %s492_s12 = smov 0   ;;  %s494_s13 = smov 0  }
   0x2   :  { %s496_s14 = smov 0  }
   0x3 LB: > { %s345_s15 = sadd.s32 4294967295, %s468_s14   ;;  %s27_s16 = sadd.s32 1, %s464_s13  ;;  %s468_s14 = sphi %s496_s14, %s15_s14   ;;  %s464_s13 = sphi %s494_s13, %s581_s13   ;;  %s460_s12 = sphi %s492_s12, %s580_s12  }
   0x4   : > { %p29_p0 = scmp.ge.s32.totalorder %s27_s16, 2  ;;  %p347_p1 = scmp.ge.s32.totalorder %s468_s14, 1 }
   0x5   : > { %p130_p2 = scmp.lt.s32.totalorder %s468_s14, 3  ;;  %p517_p4 = scmp.eq.s32.totalorder %s345_s15, 0 }
   0x6   : > { %s583_s16 = smov (%p29_p0, %s27_s16), 0  ;;  %s143_s21 = sshll.u32 %s568_s0, 4  ;;  %s144_s21 = int_to_ptr.vmem [resolvable:$true] %s143_s21 }
   0x7   : > { %p513_p3 = pnand %p347_p1, %p130_p2  ;;  %s154_s24 = sshll.u32 %s569_s1, 4  ;;  %s155_s24 = int_to_ptr.vmem [resolvable:$true] %s154_s24 }
   0x8   : > { %s576_s18 = scalar_select %p517_p4, 1, 0 }
   0x9   : > { %s575_s17 = scalar_select %p513_p3, 1, 0 }
   0xa   : > { %p371_p5 = pneg %p513_p3  ;;  %s408_s26 = scalar_lea.vmem %s144_s21, 16 }
   0xb   : > { %p409_p7 = scmp.ne.s32.totalorder %s144_s21, %s408_s26  ;;  %p416_p11 = scmp.lt.s32.totalorder %s144_s21, %s144_s21 }
   0xc   : > { %p531_p6 = pnand %p517_p4, %p371_p5  ;;  %p417_p12 = scmp.lt.s32.totalorder %s408_s26, %s408_s26 }
   0xe   : > { %p410_p8 = pneg %p531_p6  ;;  %p418_p13 = por %p417_p12, %p416_p11 }
  0x10   : > { %p411_p9 = pnand %p410_p8, %p409_p7 }
  0x12   : > { %p412_p10 = pneg %p411_p9 }
  0x14   : > { %p419_p0 = pnand %p418_p13, %p412_p10 }
  0x16   : > { %422 = shalt.err (!%p419_p0)
}
  0x17   : > { %s470_s27 = smov [#allocation2]   ;;  %s423_s28 = scalar_lea.vmem %s155_s24, 16 }
  0x18   : > { %374 = dma.vmem_to_smem (!%p531_p6), %s144_s21, 16, %s470_s27, [#allocation3]  }
  0x19   : > { %p424_p1 = scmp.ne.s32.totalorder %s155_s24, %s423_s28  ;;  %p431_p4 = scmp.lt.s32.totalorder %s155_s24, %s155_s24 }
  0x1a   : > { %p432_p3 = scmp.lt.s32.totalorder %s423_s28, %s423_s28 }
  0x1b   : > { %p426_p2 = pnand %p424_p1, %p410_p8 }
  0x1c   : > { %p433_p7 = por %p432_p3, %p431_p4 }
  0x1d   : > { %p427_p5 = pneg %p426_p2 }
  0x1f   : > { %p434_p9 = pnand %p433_p7, %p427_p5 }
  0x21   : > { %437 = shalt.err (!%p434_p9)
}
  0x22   : > { %s471_s29 = smov [#allocation4]   ;;  %p578_p10 = scmp.ne.s32.totalorder %s575_s17, 0 }
  0x23   : > { %377 = dma.vmem_to_smem (!%p531_p6), %s155_s24, 16, %s471_s29, [#allocation5]  }
  0x24   : > { %177 = sbr.rel (%p578_p10) target bundleno = 61 (0x3d), region = 32  ;;  %p579_p11 = scmp.ne.s32.totalorder (!%p578_p10), %s576_s18, 0 }
  0x2b   : > { %451 = dma.done.wait (%p579_p11), [#allocation3], 16  }
  0x2c   : > { %453 = vsyncadd (%p579_p11), [#allocation3], 4294967280 }
  0x2d   : > { %455 = dma.done.wait (%p579_p11), [#allocation5], 16  }
  0x2e   : > { %457 = vsyncadd (%p579_p11), [#allocation5], 4294967280 }
  0x2f   : > { %187 = sfence }
  0x30   : > { %p211_p3 = scmp.lt.s32.totalorder %s460_s12, 1  ;;  %s227_s30 = sld [smem:[#allocation2]] }
  0x31   : > { %s230_s4 = sld [smem:[#allocation4]]  ;;  %s357_s5 = sld [smem:[#allocation2 + $0x1]] }
  0x32   : > { %s585_s12 = smov (!%p211_p3, %s460_s12), 1  ;;  %s358_s6 = sld [smem:[#allocation4 + $0x1]] }
  0x33   : > { %s354_s7 = sshll.u32 %s585_s12, 1  ;;  %s362_s11 = sshll.u32 %s585_s12, 2 }
  0x34   : > { %s217_s10 = scalar_lea.vmem %s570_s2, %s354_s7  ;;  %s225_s18 = scalar_lea.vmem %s571_s3, %s362_s11 }
  0x35   : > { %v226_v0 = vld [vmem:[%s217_s10] sm:$0x3] }
  0x36   : > { %v228_v1 = vstv %s227_s30 }
  0x37   : > { %v229_v2 = vmul.f32 %v228_v1, %v226_v0  ;;  %v231_v3 = vstv %s230_s4  ;;  %v235_v4 = vstv %s357_s5 }
  0x38   : > { %v236_v5 = vmul.f32 %v235_v4, %v226_v0  ;;  %v238_v7 = vstv %s358_s6 }
  0x39   : > { %v232_v6 = vadd.f32 %v231_v3, %v229_v2 }
  0x3a   : > { %v239_v8 = vadd.f32 %v238_v7, %v236_v5 }
  0x3b   : > { %233 = vst [vmem:[%s225_s18] sm:$0x3] %v232_v6 }
  0x3c   : > { %359 = vst [vmem:[%s225_s18 + $0x2] sm:$0x3] %v239_v8 }
  0x3d PF: > { %s15_s14 = sadd.s32 1, %s468_s14   ;;  %s580_s12 = smov %s464_s13 }
  0x3e   : > { %p12_p4 = scmp.ge.s32.totalorder %s15_s14, 4   ;;  %s581_s13 = smov %s583_s16 }
  0x40   :  { %14 = sbr.rel (!%p12_p4) target bundleno = 3 (0x3), region = 72 }
  0x47   :  { %269 = vsyncpa [#allocation3], 1 }
  0x48   :  { %271 = vsyncpa [#allocation3 + $0x1], 1 }
  0x49   :  { %272 = vsyncpa [#allocation5], 1 }

</bundles_post_ra>
